<compile_context>
chip_gen: v6e
topology: v6e:2x2x1
jax: 0.10.0
libtpu: 0.0.40
codegen_flags: <defaults>
</compile_context>

<pallas_src>
import jax
import jax.numpy as jnp
from jax.experimental import pallas as pl
from jax.experimental.pallas import tpu as pltpu

LANE = 128
MIN_GRID_STEPS = 4  # keep both v7x TensorCores fed; harmless on single-TC v5e/v6e


def _round_up(n, m):
    return ((n + m - 1) // m) * m


def _fused_adapter_kernel(x_ref, w_ref, b_ref, o_ref):
    # y = x @ W_total + b_total  (fc1, fc2, scale and skip all folded into W_total/b_total)
    o_ref[...] = (
        jnp.dot(x_ref[...], w_ref[...], preferred_element_type=jnp.float32) + b_ref[...]
    ).astype(o_ref.dtype)


def prepare_adapter_params(w1, b1, w2, b2, *, scale=1.0, skip_connect=True):
    """Fuse fc1/fc2/scale/skip into a single lane-dense affine map.

    Call ONCE at adapter init and reuse the result for every forward call.
    w1: (D, H), b1: (H,), w2: (H, D), b2: (D,)  (weights pre-transposed vs torch Linear).
    `scale` / `skip_connect` must be static Python values (they are baked into the weights).
    """
    assert isinstance(scale, (int, float)), "scale must be a static Python number"
    D = w1.shape[0]

    # TODO(synk): dropout is fused as eval-mode identity; training-mode stochastic dropout
    # would require the unfused two-matmul kernel with pltpu.prng_seed/prng_random_bits.
    w_total = float(scale) * (w1 @ w2)              # (D, D)
    b_total = float(scale) * (b1 @ w2 + b2)         # (D,)
    if skip_connect:
        w_total = w_total + jnp.eye(D, dtype=w_total.dtype)

    # Lane-density: fold `fold` consecutive tokens into one 128-lane row via a
    # block-diagonal (kron) weight. Never fold beyond 128 lanes.
    fold = 1
    if D < LANE and LANE % D == 0:
        fold = LANE // D
    if fold > 1:
        eye = jnp.eye(fold, dtype=w_total.dtype)
        w_total = jnp.kron(eye, w_total)            # (fold*D, fold*D) == (128, 128)
        b_total = jnp.tile(b_total, fold)

    return w_total, b_total.reshape(1, -1), fold, D


def linear_adapter_fused(x, w_total, b_total, fold, D, *, tile_m=2048):
    """Forward pass: x: (..., D) -> (..., D) using prefused params."""
    orig_shape = x.shape
    assert orig_shape[-1] == D
    x2d = x.reshape(-1, D)
    M = x2d.shape[0]

    # Always take the lane-dense folded path: pad the token count to a multiple of `fold`.
    M_fold = _round_up(M, fold)
    if M_fold != M:
        x2d = jnp.pad(x2d, ((0, M_fold - M), (0, 0)))
    Mk = M_fold // fold
    Dk = fold * D
    x2d = x2d.reshape(Mk, Dk)

    # Row tile: large (amortize ~0.35us/grid-step), multiple of 8, capped so the grid keeps
    # >= MIN_GRID_STEPS steps for megacore sharding; rows are padded, never asserted.
    tm_cap = _round_up(max(1, pl.cdiv(Mk, MIN_GRID_STEPS)), 8)
    tm = max(8, min((int(tile_m) // 8) * 8, tm_cap, _round_up(Mk, 8)))
    M_pad = _round_up(Mk, tm)
    if M_pad != Mk:
        x2d = jnp.pad(x2d, ((0, M_pad - Mk), (0, 0)))

    out = pl.pallas_call(
        _fused_adapter_kernel,
        out_shape=jax.ShapeDtypeStruct((M_pad, Dk), x.dtype),
        grid_spec=pltpu.PrefetchScalarGridSpec(
            num_scalar_prefetch=0,
            grid=(M_pad // tm,),
            in_specs=[
                pl.BlockSpec((tm, Dk), lambda i: (i, 0)),   # x row tile (128-lane dense)
                pl.BlockSpec((Dk, Dk), lambda i: (0, 0)),   # W_total (VMEM-resident)
                pl.BlockSpec((1, Dk), lambda i: (0, 0)),    # b_total (VMEM-resident)
            ],
            out_specs=pl.BlockSpec((tm, Dk), lambda i: (i, 0)),
        ),
        compiler_params=pltpu.CompilerParams(
            dimension_semantics=("parallel",),          # row grid shards across TCs on v7x
            vmem_limit_bytes=32 * 1024 * 1024,          # explicit; safe on v5e/v6e/v7x
        ),
    )(x2d, w_total, b_total)

    out = out[:Mk].reshape(M_fold, D)[:M]
    return out.reshape(orig_shape)


def linear_adapter(x, w1, b1, w2, b2, *, scale=1.0, skip_connect=True, tile_m=2048):
    """Convenience one-shot wrapper (prefer hoisting prepare_adapter_params to init)."""
    params = prepare_adapter_params(w1, b1, w2, b2, scale=scale, skip_connect=skip_connect)
    return linear_adapter_fused(x, *params, tile_m=tile_m)


if __name__ == "__main__":
    # Module config: D_features=32, mlp_ratio=0.25 -> hidden=8, scale=1.0, skip_connect=True
    D_features = 32
    mlp_ratio = 0.25
    D_hidden = int(D_features * mlp_ratio)
    scale = 1.0
    skip_connect = True

    key = jax.random.PRNGKey(0)
    kx, kw1, kb1, kw2, kb2 = jax.random.split(key, 5)

    # Input: (batch=2, seq=8, D_features=32)
    x = jax.random.normal(kx, (2, 8, D_features), dtype=jnp.float32)

    # Deterministic parameters (PyTorch Linear stores (out, in); here pre-transposed (in, out)).
    w1 = jax.random.normal(kw1, (D_features, D_hidden), dtype=jnp.float32) * 0.05
    b1 = jax.random.normal(kb1, (D_hidden,), dtype=jnp.float32) * 0.05
    w2 = jax.random.normal(kw2, (D_hidden, D_features), dtype=jnp.float32) * 0.05
    b2 = jax.random.normal(kb2, (D_features,), dtype=jnp.float32) * 0.05

    def ref_fn(xx, s, skip):
        # Pure-JAX unfused reference (eval-mode dropout = identity).
        xs = xx @ w1 + b1
        xs = xs @ w2 + b2
        return xx + xs * s if skip else xs * s

    # Prepare fused / kron'd params ONCE (adapter init) and reuse for every forward call.
    params = prepare_adapter_params(w1, b1, w2, b2, scale=scale, skip_connect=skip_connect)

    # 1) Standard path (token count divisible by the 128//D fold).
    out = jax.block_until_ready(linear_adapter_fused(x, *params))
    assert jnp.allclose(out, ref_fn(x, scale, skip_connect), atol=1e-5, rtol=1e-5), \
        "mismatch vs reference"

    # 2) Ragged token count (M = 3*41 = 123): fold-padding keeps the lane-dense path.
    x_b = jax.random.normal(kx, (3, 41, D_features), dtype=jnp.float32)
    out_b = jax.block_until_ready(linear_adapter_fused(x_b, *params))
    assert jnp.allclose(out_b, ref_fn(x_b, scale, skip_connect), atol=1e-5, rtol=1e-5), \
        "mismatch vs reference (ragged)"

    # 3) No skip connection, non-unit scale (exercises the scale/skip fusion).
    params_ns = prepare_adapter_params(w1, b1, w2, b2, scale=0.5, skip_connect=False)
    out_c = jax.block_until_ready(linear_adapter_fused(x_b, *params_ns))
    assert jnp.allclose(out_c, ref_fn(x_b, 0.5, False), atol=1e-5, rtol=1e-5), \
        "mismatch vs reference (no skip / scale)"

    print("KERNEL_OK")
</pallas_src>

<mosaic_0001>
module attributes {stable_mosaic.version = 11 : i64} {
  func.func @_fused_adapter_kernel(%arg0: i32, %arg1: memref<8x128xf32, #tpu.memory_space<vmem>>, %arg2: memref<128x128xf32, #tpu.memory_space<vmem>>, %arg3: memref<1x128xf32, #tpu.memory_space<vmem>>, %arg4: memref<8x128xf32, #tpu.memory_space<vmem>>) attributes {dimension_semantics = [#tpu.dimension_semantics<parallel>], iteration_bounds = array<i64: 1>, scalar_prefetch = 0 : i64, scratch_operands = 0 : i64, tpu.core_type = #tpu.core_type<tc>, window_params = [{transform_indices = @transform_0, window_bounds = array<i64: 8, 128>}, {pipeline_mode = #tpu.pipeline_mode<synchronous>, transform_indices = @transform_1, window_bounds = array<i64: 128, 128>}, {pipeline_mode = #tpu.pipeline_mode<synchronous>, transform_indices = @transform_2, window_bounds = array<i64: 1, 128>}, {transform_indices = @transform_3, window_bounds = array<i64: 8, 128>}]} {
    %c0 = arith.constant 0 : index
    %c0_0 = arith.constant 0 : index
    %0 = vector.load %arg1[%c0, %c0_0] : memref<8x128xf32, #tpu.memory_space<vmem>>, vector<8x128xf32>
    %c0_1 = arith.constant 0 : index
    %c0_2 = arith.constant 0 : index
    %1 = vector.load %arg2[%c0_1, %c0_2] : memref<128x128xf32, #tpu.memory_space<vmem>>, vector<128x128xf32>
    %cst = arith.constant dense<0.000000e+00> : vector<8x128xf32>
    %2 = tpu.matmul %0, %1, %cst {dimension_numbers = #tpu.dot_dimension_numbers<[1], [0], [0], [1], [0, 0, 1, 1], [], []>} : vector<8x128xf32>, vector<128x128xf32>, vector<8x128xf32> -> vector<8x128xf32>
    %c0_3 = arith.constant 0 : index
    %c0_4 = arith.constant 0 : index
    %3 = vector.load %arg3[%c0_3, %c0_4] : memref<1x128xf32, #tpu.memory_space<vmem>>, vector<1x128xf32>
    %4 = vector.broadcast %3 : vector<1x128xf32> to vector<8x128xf32>
    %5 = arith.addf %2, %4 : vector<8x128xf32>
    %c0_5 = arith.constant 0 : index
    %c0_6 = arith.constant 0 : index
    %6 = vector.load %arg4[%c0_5, %c0_6] : memref<8x128xf32, #tpu.memory_space<vmem>>, vector<8x128xf32>
    tpu.vector_store %arg4[%c0_5, %c0_6], %5 {strides = array<i32>} : memref<8x128xf32, #tpu.memory_space<vmem>>, vector<8x128xf32>,
    return
  }
  func.func @transform_0(%arg0: i32) -> (i32, i32) {
    %c0_i32 = arith.constant 0 : i32
    %c0_i32_0 = arith.constant 0 : i32
    return %arg0, %c0_i32 : i32, i32
  }
  func.func @transform_1(%arg0: i32) -> (i32, i32) {
    %c0_i32 = arith.constant 0 : i32
    %c0_i32_0 = arith.constant 0 : i32
    %c0_i32_1 = arith.constant 0 : i32
    return %c0_i32, %c0_i32_0 : i32, i32
  }
  func.func @transform_2(%arg0: i32) -> (i32, i32) {
    %c0_i32 = arith.constant 0 : i32
    %c0_i32_0 = arith.constant 0 : i32
    %c0_i32_1 = arith.constant 0 : i32
    return %c0_i32, %c0_i32_0 : i32, i32
  }
  func.func @transform_3(%arg0: i32) -> (i32, i32) {
    %c0_i32 = arith.constant 0 : i32
    %c0_i32_0 = arith.constant 0 : i32
    return %arg0, %c0_i32 : i32, i32
  }
}

</mosaic_0001>

<bundles_post_ra>
// kernel: tpu_custom_call.1
= control target key start
LH: loop header
LB: loop body
LE: loop exit
PB: predicated region body
PF: predicated region fallthrough
CT: control target
= control target key end

     0   :  { %8 = vsyncpa [#allocation3], 0  ;;  %s317_s0 = inlined_call_operand.hbm [shape: f32[8,128], index: 0, kind: input, shape index: {}]   ;;  %s318_s1 = inlined_call_operand.hbm [shape: f32[128,128], index: 1, kind: input, shape index: {}]   ;;  %s319_s2 = inlined_call_operand.vmem [shape: f32[1,128], index: 2, kind: input, shape index: {}]   ;;  %s320_s3 = inlined_call_operand.hbm [shape: f32[8,128], index: 3, kind: output, shape index: {}]  }
   0x1   :  { %9 = vsyncpa [#allocation6], 0 }
   0x2   :  { %10 = vsyncpa [#allocation4], 0  ;;  %s278_s12 = smov [#allocation2]   ;;  %s279_s14 = smov [#allocation5]  }
   0x3   :  { %s17_s13 = sshll.u32 %s278_s12, 4  ;;  %s26_s15 = sshll.u32 %s279_s14, 4  ;;  %s18_s13 = int_to_ptr.vmem [resolvable:$true] %s17_s13  ;;  %s27_s15 = int_to_ptr.vmem [resolvable:$true] %s26_s15 }
   0x4   :  { %s220_s16 = scalar_lea.vmem %s18_s13, 128  ;;  %p225_p1 = scmp.lt.s32.totalorder %s18_s13, %s18_s13 }
   0x5   :  { %p221_p0 = scmp.ne.s32.totalorder %s18_s13, %s220_s16  ;;  %p226_p2 = scmp.lt.s32.totalorder %s220_s16, %s220_s16 }
   0x7   :  { %p227_p3 = por %p226_p2, %p225_p1 }
   0x9   :  { %p228_p4 = pnand %p227_p3, %p221_p0 }
   0xb   :  { %231 = shalt.err (!%p228_p4)
}
   0xc   :  { %20 = dma.hbm_to_vmem [thread:$0]  %s317_s0, 128, %s18_s13, [#allocation3]  }
   0xd   :  { %s240_s19 = scalar_lea.vmem %s27_s15, 2048  ;;  %p245_p6 = scmp.lt.s32.totalorder %s27_s15, %s27_s15 }
   0xe   :  { %p241_p5 = scmp.ne.s32.totalorder %s27_s15, %s240_s19  ;;  %p246_p7 = scmp.lt.s32.totalorder %s240_s19, %s240_s19 }
  0x10   :  { %p247_p8 = por %p246_p7, %p245_p6 }
  0x12   :  { %p248_p9 = pnand %p247_p8, %p241_p5 }
  0x14   :  { %251 = shalt.err (!%p248_p9)
}
  0x15   :  { %s280_s20 = smov 128   ;;  %s281_s21 = smov 8  }
  0x16   :  { %32 = dma.hbm_to_vmem [thread:$0]  %s318_s1, 2048, %s27_s15, [#allocation6], %s280_s20, %s280_s20, %s281_s21  }
  0x17   :  { %272 = dma.done.wait [#allocation3], 128  }
  0x18   :  { %273 = vsyncadd [#allocation3], 4294967168 }
  0x19   :  { %274 = dma.done.wait [#allocation6], 2048  }
  0x1a   :  { %275 = vsyncadd [#allocation6], 4294965248  ;;  %v282_v0 = vmov 0.0   ;;  %vm283_vm0 = vmmov 0   ;;  %v57_v1 = vld [vmem:[#allocation5 + $0x78] sm:$0xff]  ;;  %v56_v2 = vld [vmem:[#allocation5 + $0x70] sm:$0xff] }
  0x1b   :  { %170 = vmatprep.subr.mxu0 %v282_v0  ;;  %202 = vmatprep.mubr.msk.f32.mxu0 %vm283_vm0, %v282_v0  ;;  %v55_v3 = vld [vmem:[#allocation5 + $0x68] sm:$0xff]  ;;  %v54_v4 = vld [vmem:[#allocation5 + $0x60] sm:$0xff]  ;;  %v53_v5 = vld [vmem:[#allocation5 + $0x58] sm:$0xff]  ;;  %s284_s24 = smov [#allocation7]  }
  0x1c   :  { %171 = vmatpush3.msra.mxu0 %v57_v1  ;;  %v52_v6 = vld [vmem:[#allocation5 + $0x50] sm:$0xff]  ;;  %v51_v7 = vld [vmem:[#allocation5 + $0x48] sm:$0xff]  ;;  %v50_v8 = vld [vmem:[#allocation5 + $0x40] sm:$0xff]  ;;  %s142_s25 = sshll.u32 %s284_s24, 4  ;;  %s143_s25 = int_to_ptr.vmem [resolvable:$true] %s142_s25 }
  0x1d   :  { %172 = vmatprep.subr.mxu0 %v282_v0  ;;  %v49_v9 = vld [vmem:[#allocation5 + $0x38] sm:$0xff]  ;;  %v48_v10 = vld [vmem:[#allocation5 + $0x30] sm:$0xff]  ;;  %v47_v11 = vld [vmem:[#allocation5 + $0x28] sm:$0xff]  ;;  %s252_s26 = scalar_lea.vmem %s143_s25, 128  ;;  %p257_p11 = scmp.lt.s32.totalorder %s143_s25, %s143_s25 }
  0x1e   :  { %173 = vmatpush3.msra.mxu0 %v56_v2  ;;  %v46_v12 = vld [vmem:[#allocation5 + $0x20] sm:$0xff]  ;;  %v45_v13 = vld [vmem:[#allocation5 + $0x18] sm:$0xff]  ;;  %v44_v14 = vld [vmem:[#allocation5 + $0x10] sm:$0xff]  ;;  %p253_p10 = scmp.ne.s32.totalorder %s143_s25, %s252_s26  ;;  %p258_p12 = scmp.lt.s32.totalorder %s252_s26, %s252_s26 }
  0x1f   :  { %174 = vmatprep.subr.mxu0 %v282_v0  ;;  %v43_v15 = vld [vmem:[#allocation5 + $0x8] sm:$0xff]  ;;  %v42_v16 = vld [vmem:[#allocation5] sm:$0xff]  ;;  %v41_v17 = vld [vmem:[#allocation2] sm:$0xff] }
  0x20   :  { %175 = vmatpush3.msra.mxu0 %v55_v3  ;;  %v152_v18 = vld [vmem:[%s319_s2] ss:$0 sm:$0xff]  ;;  %p259_p13 = por %p258_p12, %p257_p11 }
  0x21   :  { %176 = vmatprep.subr.mxu0 %v282_v0 }
  0x22   :  { %177 = vmatpush3.msra.mxu0 %v54_v4  ;;  %p260_p0 = pnand %p259_p13, %p253_p10 }
  0x23   :  { %178 = vmatprep.subr.mxu0 %v282_v0 }
  0x24   :  { %179 = vmatpush3.msra.mxu0 %v53_v5 }
  0x25   :  { %180 = vmatprep.subr.mxu0 %v282_v0 }
  0x26   :  { %181 = vmatpush3.msra.mxu0 %v52_v6 }
  0x27   :  { %182 = vmatprep.subr.mxu0 %v282_v0 }
  0x28   :  { %183 = vmatpush3.msra.mxu0 %v51_v7 }
  0x29   :  { %184 = vmatprep.subr.mxu0 %v282_v0 }
  0x2a   :  { %185 = vmatpush3.msra.mxu0 %v50_v8 }
  0x2b   :  { %186 = vmatprep.subr.mxu0 %v282_v0 }
  0x2c   :  { %187 = vmatpush3.msra.mxu0 %v49_v9 }
  0x2d   :  { %188 = vmatprep.subr.mxu0 %v282_v0 }
  0x2e   :  { %189 = vmatpush3.msra.mxu0 %v48_v10 }
  0x2f   :  { %190 = vmatprep.subr.mxu0 %v282_v0 }
  0x30   :  { %191 = vmatpush3.msra.mxu0 %v47_v11 }
  0x31   :  { %192 = vmatprep.subr.mxu0 %v282_v0 }
  0x32   :  { %193 = vmatpush3.msra.mxu0 %v46_v12 }
  0x33   :  { %194 = vmatprep.subr.mxu0 %v282_v0 }
  0x34   :  { %195 = vmatpush3.msra.mxu0 %v45_v13 }
  0x35   :  { %196 = vmatprep.subr.mxu0 %v282_v0 }
  0x36   :  { %197 = vmatpush3.msra.mxu0 %v44_v14 }
  0x37   :  { %198 = vmatprep.subr.mxu0 %v282_v0 }
  0x38   :  { %199 = vmatpush3.msra.mxu0 %v43_v15 }
  0x39   :  { %200 = vmatprep.subr.mxu0 %v282_v0 }
  0x3a   :  { %201 = vmatpush3.msra.mxu0 %v42_v16 }
  0x3b   :  { %203 = vmatmul.mubr.f32.vlgmr.msra.gmra.mxu0 %v41_v17 }
  0xfb   :  { %v131_v19 = vpop.f32.mrf.mxu0 }
  0xfc   :  { %v132_v20 = vadd.f32 %v152_v18, %v131_v19 }
  0xfd   :  { %v204_v21 = vpop.f32.mrf.mxu0 }
  0xfe   :  { %135 = vst [vmem:[#allocation7] sm:$0xff] %v132_v20 }
  0xff   :  { %263 = shalt.err (!%p260_p0)
}
 0x100   :  { %145 = dma.vmem_to_hbm [thread:$0]  %s143_s25, 128, %s320_s3, [#allocation4]  }
 0x101   :  { %276 = dma.done.wait [#allocation4], 128  }
 0x102   :  { %277 = vsyncadd [#allocation4], 4294967168 }
 0x103   :  { %149 = vsyncpa [#allocation3], 1 }
 0x104   :  { %150 = vsyncpa [#allocation6], 1 }
 0x105   :  { %151 = vsyncpa [#allocation4], 1 }

</bundles_post_ra>
